<compile_context>
chip_gen: v7x
topology: tpu7x:2x2x1
jax: 0.10.0
libtpu: 0.0.40
codegen_flags: <defaults>
</compile_context>

<pallas_src>
import jax
import jax.numpy as jnp
from jax import lax
from jax.experimental import pallas as pl
from jax.experimental.pallas import tpu as pltpu

_EPS = 1e-8              # eps added to every distance (matches reference)
_SQ_EPS = 1e-6           # eps added under the sqrt (matches reference)
# 0.008 threshold on (dist + eps), translated to half-squared-distance space.
_THR_H = 0.5 * ((0.008 - _EPS) ** 2 - _SQ_EPS)
_BIG = 1e9               # mask sentinel in half-squared-distance space


def _hardnet_kernel(a_row_ref, p_row_ref, a_col_ref, p_col_ref,
                    a2h_row_ref, p2h_row_ref, a2h_col_ref, p2h_col_ref,
                    pos_ref, minneg_ref,
                    acc_ap, acc_aa, acc_pp):
    j = pl.program_id(1)

    # ---- init running column-min accumulators once per row block -----------
    @pl.when(j == 0)
    def _():
        big = jnp.full(acc_ap.shape, _BIG, dtype=acc_ap.dtype)
        acc_ap[...] = big
        acc_aa[...] = big
        acc_pp[...] = big

    a_row = a_row_ref[...]            # (TB, D) this block's anchors (resident)
    p_row = p_row_ref[...]            # (TB, D) this block's positives
    a_col = a_col_ref[...]            # (TC, D) streamed anchor columns
    p_col = p_col_ref[...]            # (TC, D) streamed positive columns
    a2h_row = a2h_row_ref[...]        # (TB, 1) 0.5*||a_i||^2 (precomputed)
    a2h_col = a2h_col_ref[...]        # (1, TC)
    p2h_col = p2h_col_ref[...]        # (1, TC)

    tb = a_row.shape[0]
    tc = a_col.shape[0]

    # Diagonal of this tile: global_row == global_col
    #   <=> local_col - local_row == row0 - col0   (scalar offset).
    off = pl.program_id(0) * tb - j * tc
    delta = (lax.broadcasted_iota(jnp.int32, (tb, tc), 1)
             - lax.broadcasted_iota(jnp.int32, (tb, tc), 0))
    diag = delta == off

    dn = (((1,), (1,)), ((), ()))     # contract dim 1 of both operands (MXU)
    # TODO(synk): verify via pl.lower_as_mlir that the rhs-contracting-dim=1
    # dot_general lowers without a per-step relayout of the (TC, D) operand;
    # if it does, feed the column operands pre-transposed as (D, B) blocks.

    # anchor-positive: h_ij = a2h_i + (p2h_j - g_ij); a2h_i and the clamp are
    # hoisted out of the lane-min (the 0.008 mask threshold is shifted by a2h_i
    # instead, and it already absorbs negative fp noise — no relu needed).
    g = lax.dot_general(a_row, p_col, dn, preferred_element_type=jnp.float32)
    t_ap = p2h_col - g
    thr = _THR_H - a2h_row                                        # (TB, 1)
    m_ap = jnp.min(jnp.where(diag | (t_ap < thr), _BIG, t_ap),
                   axis=1, keepdims=True)

    # anchor-anchor
    g = lax.dot_general(a_row, a_col, dn, preferred_element_type=jnp.float32)
    m_aa = jnp.min(jnp.where(diag, _BIG, a2h_col - g), axis=1, keepdims=True)

    # positive-positive (column-min of the full matrix equals this row-min by
    # symmetry, so no transpose is needed)
    g = lax.dot_general(p_row, p_col, dn, preferred_element_type=jnp.float32)
    m_pp = jnp.min(jnp.where(diag, _BIG, p2h_col - g), axis=1, keepdims=True)

    acc_ap[...] = jnp.minimum(acc_ap[...], m_ap)
    acc_aa[...] = jnp.minimum(acc_aa[...], m_aa)
    acc_pp[...] = jnp.minimum(acc_pp[...], m_pp)

    # ---- finalize: add hoisted row norms back, clamp, sqrt, store ----------
    @pl.when(j == pl.num_programs(1) - 1)
    def _():
        a2h = a2h_row
        p2h = p2h_row_ref[...]
        h_ap = acc_ap[...] + a2h                     # >= _THR_H if unmasked
        h_aa = jnp.maximum(acc_aa[...] + a2h, 0.0)   # hoisted relu clamp
        h_pp = jnp.maximum(acc_pp[...] + p2h, 0.0)
        h_min = jnp.minimum(h_ap, jnp.minimum(h_aa, h_pp))
        minneg_ref[...] = jnp.sqrt(2.0 * h_min + _SQ_EPS) + _EPS

        # positive-pair diagonal, O(TB*D) directly (no eye mask / O(B^2) pass)
        ap_dot = jnp.sum(a_row * p_row, axis=1, keepdims=True)
        h_pos = jnp.maximum(a2h + p2h - ap_dot, 0.0)
        pos_ref[...] = jnp.sqrt(2.0 * h_pos + _SQ_EPS) + _EPS


def _pick_tiles(batch):
    """Pick (row tile, column tile) that divide `batch` exactly.

    Column tile: keep the (1, TC) norm-block lane dim a multiple of 128 (or the
    full batch).  Row tile: multiple of 8 sublanes, with >= 2 row blocks where
    possible so both v7x TensorCores get work; 128 preferred (v5e MXU height,
    lower VMEM/vreg pressure), 256 for very large batches where column
    re-streaming (proportional to B/TB) starts to dominate HBM traffic.
    Falling back to the full batch keeps block shapes equal to the array dims
    (always legal) for awkward batch sizes.
    """
    tc = batch
    for cand in (512, 256, 128):
        if batch % cand == 0:
            tc = cand
            break
    row_prefs = (256, 128, 64, 32, 16, 8) if batch >= 4096 else (128, 256, 64, 32, 16, 8)
    tb = batch
    for cand in row_prefs:
        if batch % cand == 0 and batch // cand >= 2:
            tb = cand
            break
    return tb, tc


def hardnet_loss_forward(x, margin=0.2):
    """x: (3*B, D) float32 descriptors. Returns (pos (B,), min_neg (B,), loss)."""
    b3, d = x.shape
    batch = b3 // 3

    # TODO(synk): fold this strided deinterleave into the kernel input DMA
    # (needs an upstream pre-split / (B,3,D)-contiguous layout so the triplet
    # axis can be a legal BlockSpec dim); as written it is one extra XLA gather
    # pass over HBM before the kernel.
    anchors = x[0::3, :]
    positives = x[1::3, :]

    # Half squared norms, computed once here instead of once per grid step.
    a2h = 0.5 * jnp.sum(anchors * anchors, axis=1)          # (B,)
    p2h = 0.5 * jnp.sum(positives * positives, axis=1)      # (B,)

    tb, tc = _pick_tiles(batch)
    grid = (batch // tb, batch // tc)

    cost = pl.CostEstimate(
        flops=int(6 * batch * batch * d + 24 * batch * batch),
        transcendentals=int(2 * batch),
        bytes_accessed=int(4 * (2 * batch * d * (grid[0] + 1) + 8 * batch)))

    pos_col, minneg_col = pl.pallas_call(
        _hardnet_kernel,
        out_shape=(
            jax.ShapeDtypeStruct((batch, 1), jnp.float32),
            jax.ShapeDtypeStruct((batch, 1), jnp.float32),
        ),
        grid=grid,
        in_specs=[
            pl.BlockSpec((tb, d), lambda i, j: (i, 0)),   # anchor row block (resident over j)
            pl.BlockSpec((tb, d), lambda i, j: (i, 0)),   # positive row block
            pl.BlockSpec((tc, d), lambda i, j: (j, 0)),   # anchor column stream
            pl.BlockSpec((tc, d), lambda i, j: (j, 0)),   # positive column stream
            pl.BlockSpec((tb, 1), lambda i, j: (i, 0)),   # 0.5*|a|^2 row block
            pl.BlockSpec((tb, 1), lambda i, j: (i, 0)),   # 0.5*|p|^2 row block
            pl.BlockSpec((1, tc), lambda i, j: (0, j)),   # 0.5*|a|^2 column block
            pl.BlockSpec((1, tc), lambda i, j: (0, j)),   # 0.5*|p|^2 column block
        ],
        out_specs=(
            pl.BlockSpec((tb, 1), lambda i, j: (i, 0)),
            pl.BlockSpec((tb, 1), lambda i, j: (i, 0)),
        ),
        scratch_shapes=[
            pltpu.VMEM((tb, 1), jnp.float32),   # running min, a-p
            pltpu.VMEM((tb, 1), jnp.float32),   # running min, a-a
            pltpu.VMEM((tb, 1), jnp.float32),   # running min, p-p
        ],
        compiler_params=pltpu.CompilerParams(
            dimension_semantics=("parallel", "arbitrary"),
            vmem_limit_bytes=32 * 1024 * 1024),
        cost_estimate=cost,
    )(anchors, positives, anchors, positives,
      a2h.reshape(batch, 1), p2h.reshape(batch, 1),
      a2h.reshape(1, batch), p2h.reshape(1, batch))

    pos = pos_col[:, 0]
    min_neg = minneg_col[:, 0]
    # O(B) epilogue in the wrapper keeps the row-block grid axis "parallel".
    loss = jnp.mean(jnp.maximum(margin + pos - min_neg, 0.0))
    return pos, min_neg, loss


def _reference(x, margin=0.2):
    """Pure-JAX reference matching the PyTorch module."""
    a = x[0::3, :]
    p = x[1::3, :]
    batch = a.shape[0]
    eps = 1e-8

    def dmat(u, v):
        u2 = jnp.sum(u * u, axis=1, keepdims=True)
        v2 = jnp.sum(v * v, axis=1, keepdims=True)
        f = u2 + v2.T - 2.0 * (u @ v.T)
        return jnp.sqrt(jnp.maximum(f, 0.0) + 1e-6)

    eye = jnp.eye(batch, dtype=jnp.float32)
    dist = dmat(a, p) + eps
    pos = jnp.diag(dist)
    dwm = dist + eye * 10.0
    mask = ((dwm >= 0.008).astype(jnp.float32) - 1.0) * (-1.0) * 10.0
    dwm = dwm + mask
    min_neg = jnp.min(dwm, axis=1)
    da = dmat(a, a) + eps + eye * 10.0
    dp = dmat(p, p) + eps + eye * 10.0
    min_neg_a = jnp.min(da, axis=1)
    min_neg_p = jnp.min(dp, axis=0)
    min_neg = jnp.minimum(min_neg, jnp.minimum(min_neg_p, min_neg_a))
    loss = jnp.mean(jnp.maximum(margin + pos - min_neg, 0.0))
    return pos, min_neg, loss


if __name__ == "__main__":
    batch_size = 8      # -> 8 anchor/positive/negative triplets
    D = 32              # descriptor dimension
    margin = 0.2        # HardNetLoss default margin

    key = jax.random.PRNGKey(0)
    x = jax.random.normal(key, (batch_size * 3, D), dtype=jnp.float32)

    pos, min_neg, loss = hardnet_loss_forward(x, margin=margin)
    jax.block_until_ready((pos, min_neg, loss))

    pos_ref, min_neg_ref, loss_ref = _reference(x, margin=margin)
    assert jnp.allclose(pos, pos_ref, atol=1e-4, rtol=1e-4)
    assert jnp.allclose(min_neg, min_neg_ref, atol=1e-4, rtol=1e-4)
    assert jnp.allclose(loss, loss_ref, atol=1e-4, rtol=1e-4)

    print("KERNEL_OK")
</pallas_src>

<mosaic_0001>
module attributes {stable_mosaic.version = 11 : i64} {
  func.func @_hardnet_kernel(%arg0: i32, %arg1: i32, %arg2: memref<8x32xf32, #tpu.memory_space<vmem>>, %arg3: memref<8x32xf32, #tpu.memory_space<vmem>>, %arg4: memref<8x32xf32, #tpu.memory_space<vmem>>, %arg5: memref<8x32xf32, #tpu.memory_space<vmem>>, %arg6: memref<8x1xf32, #tpu.memory_space<vmem>>, %arg7: memref<8x1xf32, #tpu.memory_space<vmem>>, %arg8: memref<1x8xf32, #tpu.memory_space<vmem>>, %arg9: memref<1x8xf32, #tpu.memory_space<vmem>>, %arg10: memref<8x1xf32, #tpu.memory_space<vmem>>, %arg11: memref<8x1xf32, #tpu.memory_space<vmem>>, %arg12: memref<8x1xf32, #tpu.memory_space<vmem>>, %arg13: memref<8x1xf32, #tpu.memory_space<vmem>>, %arg14: memref<8x1xf32, #tpu.memory_space<vmem>>) attributes {dimension_semantics = [#tpu.dimension_semantics<parallel>, #tpu.dimension_semantics<arbitrary>], iteration_bounds = array<i64: 1, 1>, scalar_prefetch = 0 : i64, scratch_operands = 3 : i64, tpu.core_type = #tpu.core_type<tc>, window_params = [{transform_indices = @transform_0, window_bounds = array<i64: 8, 32>}, {transform_indices = @transform_1, window_bounds = array<i64: 8, 32>}, {transform_indices = @transform_2, window_bounds = array<i64: 8, 32>}, {transform_indices = @transform_3, window_bounds = array<i64: 8, 32>}, {transform_indices = @transform_4, window_bounds = array<i64: 8, 1>}, {transform_indices = @transform_5, window_bounds = array<i64: 8, 1>}, {transform_indices = @transform_6, window_bounds = array<i64: 1, 8>}, {transform_indices = @transform_7, window_bounds = array<i64: 1, 8>}, {transform_indices = @transform_8, window_bounds = array<i64: 8, 1>}, {transform_indices = @transform_9, window_bounds = array<i64: 8, 1>}]} {
    %c0_i32 = arith.constant 0 : i32
    %0 = arith.cmpi eq, %arg1, %c0_i32 : i32
    %1 = arith.extui %0 : i1 to i32
    %c0_i32_0 = arith.constant 0 : i32
    %2 = arith.cmpi ne, %1, %c0_i32_0 : i32
    scf.if %2 {
      %cst_38 = arith.constant 1.000000e+09 : f32
      %56 = vector.broadcast %cst_38 : f32 to vector<8x1xf32>
      %c0_39 = arith.constant 0 : index
      %c0_40 = arith.constant 0 : index
      %57 = vector.load %arg12[%c0_39, %c0_40] : memref<8x1xf32, #tpu.memory_space<vmem>>, vector<8x1xf32>
      tpu.vector_store %arg12[%c0_39, %c0_40], %56 {strides = array<i32>} : memref<8x1xf32, #tpu.memory_space<vmem>>, vector<8x1xf32>,
      %c0_41 = arith.constant 0 : index
      %c0_42 = arith.constant 0 : index
      %58 = vector.load %arg13[%c0_41, %c0_42] : memref<8x1xf32, #tpu.memory_space<vmem>>, vector<8x1xf32>
      tpu.vector_store %arg13[%c0_41, %c0_42], %56 {strides = array<i32>} : memref<8x1xf32, #tpu.memory_space<vmem>>, vector<8x1xf32>,
      %c0_43 = arith.constant 0 : index
      %c0_44 = arith.constant 0 : index
      %59 = vector.load %arg14[%c0_43, %c0_44] : memref<8x1xf32, #tpu.memory_space<vmem>>, vector<8x1xf32>
      tpu.vector_store %arg14[%c0_43, %c0_44], %56 {strides = array<i32>} : memref<8x1xf32, #tpu.memory_space<vmem>>, vector<8x1xf32>,
    } else {
    }
    %c0 = arith.constant 0 : index
    %c0_1 = arith.constant 0 : index
    %3 = vector.load %arg2[%c0, %c0_1] : memref<8x32xf32, #tpu.memory_space<vmem>>, vector<8x32xf32>
    %c0_2 = arith.constant 0 : index
    %c0_3 = arith.constant 0 : index
    %4 = vector.load %arg3[%c0_2, %c0_3] : memref<8x32xf32, #tpu.memory_space<vmem>>, vector<8x32xf32>
    %c0_4 = arith.constant 0 : index
    %c0_5 = arith.constant 0 : index
    %5 = vector.load %arg4[%c0_4, %c0_5] : memref<8x32xf32, #tpu.memory_space<vmem>>, vector<8x32xf32>
    %c0_6 = arith.constant 0 : index
    %c0_7 = arith.constant 0 : index
    %6 = vector.load %arg5[%c0_6, %c0_7] : memref<8x32xf32, #tpu.memory_space<vmem>>, vector<8x32xf32>
    %c0_8 = arith.constant 0 : index
    %c0_9 = arith.constant 0 : index
    %7 = vector.load %arg6[%c0_8, %c0_9] : memref<8x1xf32, #tpu.memory_space<vmem>>, vector<8x1xf32>
    %c0_10 = arith.constant 0 : index
    %c0_11 = arith.constant 0 : index
    %8 = vector.load %arg8[%c0_10, %c0_11] : memref<1x8xf32, #tpu.memory_space<vmem>>, vector<1x8xf32>
    %c0_12 = arith.constant 0 : index
    %c0_13 = arith.constant 0 : index
    %9 = vector.load %arg9[%c0_12, %c0_13] : memref<1x8xf32, #tpu.memory_space<vmem>>, vector<1x8xf32>
    %c8_i32 = arith.constant 8 : i32
    %10 = arith.muli %arg0, %c8_i32 : i32
    %c8_i32_14 = arith.constant 8 : i32
    %11 = arith.muli %arg1, %c8_i32_14 : i32
    %12 = arith.subi %10, %11 : i32
    %13 = tpu.iota {dimensions = array<i32: 1>} : vector<8x8xi32>
    %14 = tpu.iota {dimensions = array<i32: 0>} : vector<8x8xi32>
    %15 = arith.subi %13, %14 : vector<8x8xi32>
    %16 = vector.broadcast %12 : i32 to vector<8x8xi32>
    %17 = arith.cmpi eq, %15, %16 : vector<8x8xi32>
    %cst = arith.constant dense<0.000000e+00> : vector<8x8xf32>
    %18 = tpu.matmul %3, %6, %cst {dimension_numbers = #tpu.dot_dimension_numbers<[1], [1], [0], [0], [0, 0, 1, 0], [], []>} : vector<8x32xf32>, vector<8x32xf32>, vector<8x8xf32> -> vector<8x8xf32>
    %19 = vector.broadcast %9 : vector<1x8xf32> to vector<8x8xf32>
    %20 = arith.subf %19, %18 : vector<8x8xf32>
    %cst_15 = arith.constant 3.14999197E-5 : f32
    %21 = vector.broadcast %cst_15 : f32 to vector<8x1xf32>
    %22 = arith.subf %21, %7 : vector<8x1xf32>
    %23 = vector.broadcast %22 : vector<8x1xf32> to vector<8x8xf32>
    %24 = arith.cmpf olt, %20, %23 : vector<8x8xf32>
    %25 = arith.ori %17, %24 : vector<8x8xi1>
    %cst_16 = arith.constant 1.000000e+09 : f32
    %26 = vector.broadcast %cst_16 : f32 to vector<8x8xf32>
    %27 = arith.select %25, %26, %20 : vector<8x8xi1>, vector<8x8xf32>
    %cst_17 = arith.constant dense<0x7F800000> : vector<8xf32>
    %28 = vector.multi_reduction <minimumf>, %27, %cst_17 [1] : vector<8x8xf32> to vector<8xf32>
    %29 = vector.shape_cast %28 : vector<8xf32> to vector<8x1xf32>
    %cst_18 = arith.constant dense<0.000000e+00> : vector<8x8xf32>
    %30 = tpu.matmul %3, %5, %cst_18 {dimension_numbers = #tpu.dot_dimension_numbers<[1], [1], [0], [0], [0, 0, 1, 0], [], []>} : vector<8x32xf32>, vector<8x32xf32>, vector<8x8xf32> -> vector<8x8xf32>
    %31 = vector.broadcast %8 : vector<1x8xf32> to vector<8x8xf32>
    %32 = arith.subf %31, %30 : vector<8x8xf32>
    %cst_19 = arith.constant 1.000000e+09 : f32
    %33 = vector.broadcast %cst_19 : f32 to vector<8x8xf32>
    %34 = arith.select %17, %33, %32 : vector<8x8xi1>, vector<8x8xf32>
    %cst_20 = arith.constant dense<0x7F800000> : vector<8xf32>
    %35 = vector.multi_reduction <minimumf>, %34, %cst_20 [1] : vector<8x8xf32> to vector<8xf32>
    %36 = vector.shape_cast %35 : vector<8xf32> to vector<8x1xf32>
    %cst_21 = arith.constant dense<0.000000e+00> : vector<8x8xf32>
    %37 = tpu.matmul %4, %6, %cst_21 {dimension_numbers = #tpu.dot_dimension_numbers<[1], [1], [0], [0], [0, 0, 1, 0], [], []>} : vector<8x32xf32>, vector<8x32xf32>, vector<8x8xf32> -> vector<8x8xf32>
    %38 = vector.broadcast %9 : vector<1x8xf32> to vector<8x8xf32>
    %39 = arith.subf %38, %37 : vector<8x8xf32>
    %cst_22 = arith.constant 1.000000e+09 : f32
    %40 = vector.broadcast %cst_22 : f32 to vector<8x8xf32>
    %41 = arith.select %17, %40, %39 : vector<8x8xi1>, vector<8x8xf32>
    %cst_23 = arith.constant dense<0x7F800000> : vector<8xf32>
    %42 = vector.multi_reduction <minimumf>, %41, %cst_23 [1] : vector<8x8xf32> to vector<8xf32>
    %43 = vector.shape_cast %42 : vector<8xf32> to vector<8x1xf32>
    %c0_24 = arith.constant 0 : index
    %c0_25 = arith.constant 0 : index
    %44 = vector.load %arg12[%c0_24, %c0_25] : memref<8x1xf32, #tpu.memory_space<vmem>>, vector<8x1xf32>
    %45 = arith.minimumf %44, %29 : vector<8x1xf32>
    %c0_26 = arith.constant 0 : index
    %c0_27 = arith.constant 0 : index
    %46 = vector.load %arg12[%c0_26, %c0_27] : memref<8x1xf32, #tpu.memory_space<vmem>>, vector<8x1xf32>
    tpu.vector_store %arg12[%c0_26, %c0_27], %45 {strides = array<i32>} : memref<8x1xf32, #tpu.memory_space<vmem>>, vector<8x1xf32>,
    %c0_28 = arith.constant 0 : index
    %c0_29 = arith.constant 0 : index
    %47 = vector.load %arg13[%c0_28, %c0_29] : memref<8x1xf32, #tpu.memory_space<vmem>>, vector<8x1xf32>
    %48 = arith.minimumf %47, %36 : vector<8x1xf32>
    %c0_30 = arith.constant 0 : index
    %c0_31 = arith.constant 0 : index
    %49 = vector.load %arg13[%c0_30, %c0_31] : memref<8x1xf32, #tpu.memory_space<vmem>>, vector<8x1xf32>
    tpu.vector_store %arg13[%c0_30, %c0_31], %48 {strides = array<i32>} : memref<8x1xf32, #tpu.memory_space<vmem>>, vector<8x1xf32>,
    %c0_32 = arith.constant 0 : index
    %c0_33 = arith.constant 0 : index
    %50 = vector.load %arg14[%c0_32, %c0_33] : memref<8x1xf32, #tpu.memory_space<vmem>>, vector<8x1xf32>
    %51 = arith.minimumf %50, %43 : vector<8x1xf32>
    %c0_34 = arith.constant 0 : index
    %c0_35 = arith.constant 0 : index
    %52 = vector.load %arg14[%c0_34, %c0_35] : memref<8x1xf32, #tpu.memory_space<vmem>>, vector<8x1xf32>
    tpu.vector_store %arg14[%c0_34, %c0_35], %51 {strides = array<i32>} : memref<8x1xf32, #tpu.memory_space<vmem>>, vector<8x1xf32>,
    %c0_i32_36 = arith.constant 0 : i32
    %53 = arith.cmpi eq, %arg1, %c0_i32_36 : i32
    %54 = arith.extui %53 : i1 to i32
    %c0_i32_37 = arith.constant 0 : i32
    %55 = arith.cmpi ne, %54, %c0_i32_37 : i32
    scf.if %55 {
      %c0_38 = arith.constant 0 : index
      %c0_39 = arith.constant 0 : index
      %56 = vector.load %arg7[%c0_38, %c0_39] : memref<8x1xf32, #tpu.memory_space<vmem>>, vector<8x1xf32>
      %c0_40 = arith.constant 0 : index
      %c0_41 = arith.constant 0 : index
      %57 = vector.load %arg12[%c0_40, %c0_41] : memref<8x1xf32, #tpu.memory_space<vmem>>, vector<8x1xf32>
      %58 = arith.addf %57, %7 : vector<8x1xf32>
      %c0_42 = arith.constant 0 : index
      %c0_43 = arith.constant 0 : index
      %59 = vector.load %arg13[%c0_42, %c0_43] : memref<8x1xf32, #tpu.memory_space<vmem>>, vector<8x1xf32>
      %60 = arith.addf %59, %7 : vector<8x1xf32>
      %cst_44 = arith.constant 0.000000e+00 : f32
      %61 = vector.broadcast %cst_44 : f32 to vector<8x1xf32>
      %62 = arith.maximumf %60, %61 : vector<8x1xf32>
      %c0_45 = arith.constant 0 : index
      %c0_46 = arith.constant 0 : index
      %63 = vector.load %arg14[%c0_45, %c0_46] : memref<8x1xf32, #tpu.memory_space<vmem>>, vector<8x1xf32>
      %64 = arith.addf %63, %56 : vector<8x1xf32>
      %cst_47 = arith.constant 0.000000e+00 : f32
      %65 = vector.broadcast %cst_47 : f32 to vector<8x1xf32>
      %66 = arith.maximumf %64, %65 : vector<8x1xf32>
      %67 = arith.minimumf %62, %66 : vector<8x1xf32>
      %68 = arith.minimumf %58, %67 : vector<8x1xf32>
      %cst_48 = arith.constant 2.000000e+00 : f32
      %69 = vector.broadcast %cst_48 : f32 to vector<8x1xf32>
      %70 = arith.mulf %69, %68 : vector<8x1xf32>
      %cst_49 = arith.constant 9.99999997E-7 : f32
      %71 = vector.broadcast %cst_49 : f32 to vector<8x1xf32>
      %72 = arith.addf %70, %71 : vector<8x1xf32>
      %73 = math.sqrt %72 : vector<8x1xf32>
      %cst_50 = arith.constant 9.99999993E-9 : f32
      %74 = vector.broadcast %cst_50 : f32 to vector<8x1xf32>
      %75 = arith.addf %73, %74 : vector<8x1xf32>
      %c0_51 = arith.constant 0 : index
      %c0_52 = arith.constant 0 : index
      %76 = vector.load %arg11[%c0_51, %c0_52] : memref<8x1xf32, #tpu.memory_space<vmem>>, vector<8x1xf32>
      tpu.vector_store %arg11[%c0_51, %c0_52], %75 {strides = array<i32>} : memref<8x1xf32, #tpu.memory_space<vmem>>, vector<8x1xf32>,
      %77 = arith.mulf %3, %4 : vector<8x32xf32>
      %cst_53 = arith.constant dense<0.000000e+00> : vector<8xf32>
      %78 = vector.multi_reduction <add>, %77, %cst_53 [1] : vector<8x32xf32> to vector<8xf32>
      %79 = vector.shape_cast %78 : vector<8xf32> to vector<8x1xf32>
      %80 = arith.addf %7, %56 : vector<8x1xf32>
      %81 = arith.subf %80, %79 : vector<8x1xf32>
      %cst_54 = arith.constant 0.000000e+00 : f32
      %82 = vector.broadcast %cst_54 : f32 to vector<8x1xf32>
      %83 = arith.maximumf %81, %82 : vector<8x1xf32>
      %cst_55 = arith.constant 2.000000e+00 : f32
      %84 = vector.broadcast %cst_55 : f32 to vector<8x1xf32>
      %85 = arith.mulf %84, %83 : vector<8x1xf32>
      %cst_56 = arith.constant 9.99999997E-7 : f32
      %86 = vector.broadcast %cst_56 : f32 to vector<8x1xf32>
      %87 = arith.addf %85, %86 : vector<8x1xf32>
      %88 = math.sqrt %87 : vector<8x1xf32>
      %cst_57 = arith.constant 9.99999993E-9 : f32
      %89 = vector.broadcast %cst_57 : f32 to vector<8x1xf32>
      %90 = arith.addf %88, %89 : vector<8x1xf32>
      %c0_58 = arith.constant 0 : index
      %c0_59 = arith.constant 0 : index
      %91 = vector.load %arg10[%c0_58, %c0_59] : memref<8x1xf32, #tpu.memory_space<vmem>>, vector<8x1xf32>
      tpu.vector_store %arg10[%c0_58, %c0_59], %90 {strides = array<i32>} : memref<8x1xf32, #tpu.memory_space<vmem>>, vector<8x1xf32>,
    } else {
    }
    return
  }
  func.func @transform_0(%arg0: i32, %arg1: i32) -> (i32, i32) {
    %c0_i32 = arith.constant 0 : i32
    %c0_i32_0 = arith.constant 0 : i32
    return %arg0, %c0_i32 : i32, i32
  }
  func.func @transform_1(%arg0: i32, %arg1: i32) -> (i32, i32) {
    %c0_i32 = arith.constant 0 : i32
    %c0_i32_0 = arith.constant 0 : i32
    return %arg0, %c0_i32 : i32, i32
  }
  func.func @transform_2(%arg0: i32, %arg1: i32) -> (i32, i32) {
    %c0_i32 = arith.constant 0 : i32
    %c0_i32_0 = arith.constant 0 : i32
    return %arg1, %c0_i32 : i32, i32
  }
  func.func @transform_3(%arg0: i32, %arg1: i32) -> (i32, i32) {
    %c0_i32 = arith.constant 0 : i32
    %c0_i32_0 = arith.constant 0 : i32
    return %arg1, %c0_i32 : i32, i32
  }
  func.func @transform_4(%arg0: i32, %arg1: i32) -> (i32, i32) {
    %c0_i32 = arith.constant 0 : i32
    %c0_i32_0 = arith.constant 0 : i32
    return %arg0, %c0_i32 : i32, i32
  }
  func.func @transform_5(%arg0: i32, %arg1: i32) -> (i32, i32) {
    %c0_i32 = arith.constant 0 : i32
    %c0_i32_0 = arith.constant 0 : i32
    return %arg0, %c0_i32 : i32, i32
  }
  func.func @transform_6(%arg0: i32, %arg1: i32) -> (i32, i32) {
    %c0_i32 = arith.constant 0 : i32
    %c0_i32_0 = arith.constant 0 : i32
    return %c0_i32, %arg1 : i32, i32
  }
  func.func @transform_7(%arg0: i32, %arg1: i32) -> (i32, i32) {
    %c0_i32 = arith.constant 0 : i32
    %c0_i32_0 = arith.constant 0 : i32
    return %c0_i32, %arg1 : i32, i32
  }
  func.func @transform_8(%arg0: i32, %arg1: i32) -> (i32, i32) {
    %c0_i32 = arith.constant 0 : i32
    %c0_i32_0 = arith.constant 0 : i32
    return %arg0, %c0_i32 : i32, i32
  }
  func.func @transform_9(%arg0: i32, %arg1: i32) -> (i32, i32) {
    %c0_i32 = arith.constant 0 : i32
    %c0_i32_0 = arith.constant 0 : i32
    return %arg0, %c0_i32 : i32, i32
  }
}

</mosaic_0001>

<bundles_post_ra>
// kernel: tpu_custom_call.1
= control target key start
LH: loop header
LB: loop body
LE: loop exit
PB: predicated region body
PF: predicated region fallthrough
CT: control target
= control target key end

     0   :  { %15 = vsyncpa [#allocation6], 0  ;;  %s452_s30 = smov [#allocation5]   ;;  %s570_s0 = inlined_call_operand.vmem [shape: f32[8,32], index: 0, kind: input, shape index: {}]   ;;  %s571_s1 = inlined_call_operand.vmem [shape: f32[8,32], index: 1, kind: input, shape index: {}]   ;;  %s572_s2 = inlined_call_operand.vmem [shape: f32[8,32], index: 2, kind: input, shape index: {}]   ;;  %s573_s3 = inlined_call_operand.hbm [shape: f32[8,32], index: 3, kind: input, shape index: {}]   ;;  %s574_s4 = inlined_call_operand.vmem [shape: f32[8,1], index: 4, kind: input, shape index: {}]   ;;  %s575_s5 = inlined_call_operand.vmem [shape: f32[8,1], index: 5, kind: input, shape index: {}]   ;;  %s576_s6 = inlined_call_operand.vmem [shape: f32[1,8], index: 6, kind: input, shape index: {}]   ;;  %s577_s7 = inlined_call_operand.vmem [shape: f32[1,8], index: 7, kind: input, shape index: {}]   ;;  %s578_s8 = inlined_call_operand.vmem [shape: f32[8,1], index: 8, kind: output, shape index: {0}]   ;;  %s579_s9 = inlined_call_operand.vmem [shape: f32[8,1], index: 9, kind: output, shape index: {1}]  }
   0x1   :  { %s28_s10 = sshll.u32 %s452_s30, 4  ;;  %s428_s13 = scalar_lea.hbm %s573_s3, 128  ;;  %s29_s10 = int_to_ptr.vmem [resolvable:$true] %s28_s10 }
   0x2   :  { %p429_p0 = scmp.ne.s32.totalorder %s573_s3, %s428_s13  ;;  %p432_p1 = scmp.lt.u32.totalorder %s428_s13, %s573_s3 }
   0x4   :  { %p434_p2 = pnand %p432_p1, %p429_p0 }
   0x6   :  { %437 = shalt.err (!%p434_p2)
}
   0x7   :  { %s438_s18 = scalar_lea.vmem %s29_s10, 128  ;;  %p443_p4 = scmp.lt.s32.totalorder %s29_s10, %s29_s10 }
   0x8   :  { %p439_p3 = scmp.ne.s32.totalorder %s29_s10, %s438_s18  ;;  %p444_p5 = scmp.lt.s32.totalorder %s438_s18, %s438_s18 }
   0xa   :  { %p445_p6 = por %p444_p5, %p443_p4 }
   0xc   :  { %p446_p7 = pnand %p445_p6, %p439_p3 }
   0xe   :  { %449 = shalt.err (!%p446_p7)
}
   0xf   :  { %31 = dma.hbm_to_vmem [thread:$0]  %s573_s3, 128, %s29_s10, [#allocation6]  }
  0x10   :  { %450 = dma.done.wait [#allocation6], 128  }
  0x11   :  { %451 = vsyncadd [#allocation6], 4294967168  ;;  %v453_v0 = vmov 0.0   ;;  %vm454_vm0 = vmmov 0   ;;  %v455_v1 = vmov 0   ;;  %vm68_vm1 = vcmask 261120  }
  0x12   :  { %403 = vmatprep.subr.mxu0 %v453_v0  ;;  %405 = vmatprep.mubr.msk.f32.mxu0 %vm454_vm0, %v453_v0  ;;  %v54_v2 = vld [vmem:[#allocation5] sm:$0xff]  ;;  %v53_v3 = vld [vmem:[%s572_s2] sm:$0xff]  ;;  %vm47_vm2 = vcmask 7168   ;;  %v456_v8 = vmov 1e+09   ;;  %v61_v9 = vlaneseq  ;;  %vm161_vm5 = vcmask 64512  }
  0x13   :  { %408 = vmatprep.subr.mxu1 %v453_v0  ;;  %410 = vmatprep.mubr.msk.f32.mxu1 %vm454_vm0, %v453_v0  ;;  %v51_v4 = vld [vmem:[%s570_s0] sm:$0xff]  ;;  %49 = vst.msk [vmem:[#allocation3] sm:$0xff] %vm47_vm2, %v456_v8  ;;  %48 = vst.msk [vmem:[#allocation2] sm:$0xff] %vm47_vm2, %v456_v8 }
  0x14   :  { %423 = vset.pattern.permute.xlu0 %v455_v1  ;;  %404 = vmatpush3.xpose.msk.msra.mxu0 %vm68_vm1, %v54_v2  ;;  %v532_v5 = vld [vmem:[%s574_s4] sm:$0xff]  ;;  %50 = vst.msk [vmem:[#allocation4] sm:$0xff] %vm47_vm2, %v456_v8  ;;  %v62_v10 = vand.u32 127, %v61_v9  ;;  %v64_v11 = vshrl.u32 %v61_v9, 7 }
  0x15   :  { %409 = vmatpush3.xpose.msk.msra.mxu1 %vm68_vm1, %v53_v3  ;;  %413 = vmatprep.subr.mxu0 %v453_v0  ;;  %v152_v6 = vsub.f32 3.149992e-05, %v532_v5  ;;  %v52_v7 = vld [vmem:[%s571_s1] sm:$0xff] }
  0x16   :  { %v391_v12 = vld [vmem:[%s577_s7] ss:$0 sm:$0xff]  ;;  %v65_v13 = vsub.s32 %v62_v10, %v64_v11  ;;  %v362_v30 = vmul.f32 %v52_v7, %v51_v4 }
  0x17   :  { %406 = vmatmul.mubr.msk.f32.vlgmr.msra.gmra.mrb[0].mxu0 %vm68_vm1, %v51_v4  ;;  %155 = vperm.xlu0 %423, %v152_v6   ;;  %v394_v14 = vld [vmem:[%s576_s6] ss:$0 sm:$0xff] }
  0x18   :  { %411 = vmatmul.mubr.msk.f32.vlgmr.msra.gmra.mrb[0].mxu1 %vm68_vm1, %v51_v4  ;;  %414 = vmatpush3.xpose.msk.msra.mxu0 %vm68_vm1, %v54_v2  ;;  %vm67_vm3 = vcmp.eq.s32.totalorder %v65_v13, 0  ;;  %v363_v32 = vsel %vm68_vm1, %v362_v30, 0.0  ;;  %v340_v40 = vld [vmem:[%s575_s5] sm:$0xff] }
  0x19   :  { %415 = vmatprep.mubr.msk.f32.mxu0 %vm454_vm0, %v453_v0  ;;  %v366_v43 = vadd.f32 %v340_v40, %v532_v5 }
  0x1a   :  { %v331_v33 = vld [vmem:[#allocation3] sm:$0xff]  ;;  %v327_v39 = vld [vmem:[#allocation2] sm:$0xff] }
  0x1b   :  { %416 = vmatmul.mubr.msk.f32.vlgmr.msra.gmra.mrb[2].mxu0 %vm68_vm1, %v52_v7  ;;  %v334_v36 = vld [vmem:[#allocation4] sm:$0xff] }
  0x96   :  { %v156_v15 = vpop.permute.xlu0 %155 }
  0xea   :  { %v141_v16 = vpop.f32.mrb[0].mxu0 }
  0xeb   :  { %v234_v17 = vpop.f32.mrb[0].mxu1  ;;  %v151_v18 = vsub.f32 %v391_v12, %v141_v16  ;;  %v407_v19 = vpop.f32.mrb[1].mxu0 }
  0xec   :  { %v244_v20 = vsub.f32 %v394_v14, %v234_v17  ;;  %v412_v21 = vpop.f32.mrb[1].mxu1 }
  0xed   :  { %vm158_vm4 = vcmp.lt.f32.partialorder %v151_v18, %v156_v15 }
  0xee   :  { %v245_v22 = vsel %vm67_vm3, 1e+09, %v244_v20  ;;  %v318_v23 = vpop.f32.mrb[2].mxu0  ;;  %vm159_vm6 = vmor %vm67_vm3, %vm158_vm4 }
  0xef   :  { %v246_v24 = vsel %vm161_vm5, %v245_v22, inf  ;;  %v322_v25 = vsub.f32 %v391_v12, %v318_v23  ;;  %v417_v26 = vpop.f32.mrb[3].mxu0  ;;  %v160_v29 = vsel %vm159_vm6, 1e+09, %v151_v18 }
  0xf0   :  { %247 = vmin.xlane.f32.xlu0 %v246_v24  ;;  %v162_v31 = vsel %vm161_vm5, %v160_v29, inf }
  0xf1   :  { %v323_v27 = vsel %vm67_vm3, 1e+09, %v322_v25 }
  0xf2   :  { %v324_v28 = vsel %vm161_vm5, %v323_v27, inf }
  0xf3   :  { %325 = vmin.xlane.f32.xlu1 %v324_v28 }
  0xf7   :  { %163 = vmin.xlane.f32.xlu1 %v162_v31 }
  0xfb   :  { %364 = vadd.xlane.f32.xlu1 %v363_v32 }
 0x17d   :  { %v248_v34 = vpop.xlane.xlu0 %247 }
 0x17e   :  { %v332_v35 = vmin.f32 %v331_v33, %v248_v34 }
 0x180   :  { %333 = vst.msk [vmem:[#allocation3] sm:$0xff] %vm47_vm2, %v332_v35  ;;  %v326_v37 = vpop.xlane.xlu1 %325 }
 0x181   :  { %v335_v38 = vmin.f32 %v334_v36, %v326_v37 }
 0x183   :  { %336 = vst.msk [vmem:[#allocation4] sm:$0xff] %vm47_vm2, %v335_v38 }
 0x184   :  { %v164_v41 = vpop.xlane.xlu1 %163 }
 0x185   :  { %v328_v42 = vmin.f32 %v327_v39, %v164_v41 }
 0x187   :  { %v343_v44 = vld [vmem:[#allocation3] sm:$0xff]  ;;  %330 = vst.msk [vmem:[#allocation2] sm:$0xff] %vm47_vm2, %v328_v42 }
 0x188   :  { %v344_v45 = vadd.f32 %v343_v44, %v532_v5  ;;  %v365_v46 = vpop.xlane.xlu1 %364 }
 0x189   :  { %v367_v47 = vsub.f32 %v366_v43, %v365_v46 }
 0x18a   :  { %v346_v48 = vld [vmem:[#allocation4] sm:$0xff]  ;;  %v345_v49 = vmax.f32 %v344_v45, 0.0 }
 0x18b   :  { %v347_v50 = vadd.f32 %v346_v48, %v340_v40  ;;  %v368_v51 = vmax.f32 %v367_v47, 0.0 }
 0x18d   :  { %v348_v52 = vmax.f32 %v347_v50, 0.0  ;;  %v369_v53 = vmul.f32 2.0, %v368_v51 }
 0x18e   :  { %v341_v54 = vld [vmem:[#allocation2] sm:$0xff] }
 0x18f   :  { %v342_v55 = vadd.f32 %v341_v54, %v532_v5  ;;  %v349_v56 = vmin.f32 %v345_v49, %v348_v52  ;;  %v370_v57 = vadd.f32 1e-06, %v369_v53 }
 0x191   :  { %v350_v58 = vmin.f32 %v342_v55, %v349_v56  ;;  %424 = vrsqrt.f32 %v370_v57  ;;  %vm373_vm7 = vcmp.eq.f32.partialorder %v370_v57, inf  ;;  %v376_v63 = vand.u32 2147483648, %v370_v57 }
 0x192   :  { %vm375_vm8 = vcmp.eq.f32.partialorder %v370_v57, 0.0 }
 0x193   :  { %v351_v59 = vmul.f32 2.0, %v350_v58 }
 0x195   :  { %v352_v60 = vadd.f32 1e-06, %v351_v59 }
 0x197   :  { %426 = vrsqrt.f32 %v352_v60  ;;  %vm355_vm9 = vcmp.eq.f32.partialorder %v352_v60, inf  ;;  %v358_v5 = vand.u32 2147483648, %v352_v60  ;;  %vm357_vm10 = vcmp.eq.f32.partialorder %v352_v60, 0.0 }
 0x19b   :  { %v425_v61 = vpop.eup %424 }
 0x19c   :  { %v372_v62 = vmul.f32 %v425_v61, %v370_v57 }
 0x19e   :  { %v374_v0 = vsel %vm373_vm7, %v370_v57, %v372_v62 }
 0x19f   :  { %v377_v1 = vsel %vm375_vm8, %v376_v63, %v374_v0 }
 0x1a0   :  { %v378_v2 = vadd.f32 1e-08, %v377_v1 }
 0x1a1   :  { %v427_v3 = vpop.eup %426 }
 0x1a2   :  { %v354_v4 = vmul.f32 %v427_v3, %v352_v60  ;;  %379 = vst.msk [vmem:[%s578_s8] sm:$0xff] %vm47_vm2, %v378_v2 }
 0x1a4   :  { %v356_v6 = vsel %vm355_vm9, %v352_v60, %v354_v4 }
 0x1a5   :  { %v359_v7 = vsel %vm357_vm10, %v358_v5, %v356_v6 }
 0x1a6   :  { %v360_v8 = vadd.f32 1e-08, %v359_v7 }
 0x1a8   :  { %361 = vst.msk [vmem:[%s579_s9] sm:$0xff] %vm47_vm2, %v360_v8 }
 0x1a9   :  { %388 = vsyncpa [#allocation6], 1 }

</bundles_post_ra>
